<compile_context>
chip_gen: v6e
topology: v6e:2x2x1
jax: 0.10.0
libtpu: 0.0.40
codegen_flags: <defaults>
</compile_context>

<pallas_src>
import functools

import jax
import jax.numpy as jnp
from jax.experimental import pallas as pl
from jax.experimental.pallas import tpu as pltpu


def _at_loss_kernel(logits_ref, labels_ref, out_ref, acc_ref, *,
                    batch, tile_b, steps_per_core):
    c = pl.program_id(0)          # core-split axis ("parallel")
    i = pl.program_id(1)          # per-core batch-tile axis ("arbitrary")

    @pl.when(i == 0)
    def _():
        acc_ref[...] = jnp.zeros_like(acc_ref)

    logits = logits_ref[...].astype(jnp.float32)      # (tile_b, C)
    labels = labels_ref[...].astype(jnp.float32)      # (tile_b, C)
    tb, nc = logits.shape

    # Validity mask: drop the threshold column (folded into the +2.0/row
    # constant below) and rows past the real batch (boundary blocks may hold
    # uninitialized data).  Masking stays a select AFTER the arithmetic, so it
    # is NaN/Inf-safe against garbage in boundary blocks.
    col = jax.lax.broadcasted_iota(jnp.int32, (tb, nc), 1)
    row = jax.lax.broadcasted_iota(jnp.int32, (tb, nc), 0)
    row_start = (c * steps_per_core + i) * tile_b
    valid = jnp.logical_and(col >= 1, row + row_start < batch)

    th = logits[:, 0:1]                               # per-row threshold logit
    relu_p = jnp.maximum(1.0 - logits + th, 0.0)
    relu_n = jnp.maximum(1.0 + logits - th, 0.0)
    # == relu_p * labels + relu_n * (1 - labels), one fewer multiply.
    elem = relu_n + labels * (relu_p - relu_n)
    elem = jnp.where(valid, elem, 0.0)

    # Per-step accumulation: vertical VALU adds + one sublane fold; the
    # expensive cross-lane reduction is deferred to the final step.
    acc_ref[...] += jnp.sum(elem, axis=0, keepdims=True)

    @pl.when(i == pl.num_programs(1) - 1)
    def _():
        # Constant column-0 contribution: exactly 2.0 per valid row of this
        # core's batch range (valid because the reference zeroes labels[:, 0]
        # before building p_mask/n_mask, so the input labels[:, 0] is ignored).
        core_row0 = c * steps_per_core * tile_b
        n_rows = jnp.minimum(jnp.maximum(batch - core_row0, 0),
                             steps_per_core * tile_b).astype(jnp.float32)
        out_ref[0, 0] = jnp.sum(acc_ref[...]) + 2.0 * n_rows


def at_loss(logits, labels, *, tile_b=None, num_split=2):
    """Margin loss over [B, C] logits/labels. Returns a scalar float32."""
    assert logits.ndim == 2 and logits.shape == labels.shape
    B, C = logits.shape

    # Sublane-packing requirement of the narrowest input dtype
    # (f32 -> 8 rows, bf16 -> 16, int8/bool -> 32).
    sub = 8
    for dt in (logits.dtype, labels.dtype):
        sub = max(sub, 32 // max(1, jnp.dtype(dt).itemsize))

    # Per-generation block sizing using the lane-padded VMEM footprint.
    try:
        vmem_cap = pltpu.get_tpu_info().vmem_capacity_bytes
    except Exception:  # pragma: no cover - conservative fallback
        vmem_cap = 64 * 1024 * 1024
    if vmem_cap <= 80 * 1024 * 1024:          # v7x-class: 64 MiB VMEM per TC
        block_bytes, vmem_limit = 2 * 1024 * 1024, 32 * 1024 * 1024
    else:                                     # v5e / v6e: 128 MiB VMEM
        block_bytes, vmem_limit = 4 * 1024 * 1024, 64 * 1024 * 1024

    c_phys = ((C + 127) // 128) * 128         # lane-padded class width in VMEM
    if tile_b is None:
        tile_b = block_bytes // (c_phys * 4)  # size against f32 temporaries
    b_ceil = ((B + sub - 1) // sub) * sub
    tile_b = int(max(sub, min((int(tile_b) // sub) * sub, b_ceil)))

    grid_b = pl.cdiv(B, tile_b)
    num_split = max(1, min(int(num_split), grid_b))
    spc = pl.cdiv(grid_b, num_split)          # batch tiles per core

    def in_map(c, i):
        # Clamp so the DMA window stays in-bounds; overshoot tiles are fully
        # masked in-kernel via the unclamped row offset.
        return (jnp.minimum(c * spc + i, grid_b - 1), 0)

    kernel = functools.partial(
        _at_loss_kernel, batch=B, tile_b=tile_b, steps_per_core=spc)

    bytes_accessed = int(
        logits.size * jnp.dtype(logits.dtype).itemsize
        + labels.size * jnp.dtype(labels.dtype).itemsize
        + num_split * 4)

    partials = pl.pallas_call(
        kernel,
        out_shape=jax.ShapeDtypeStruct((num_split, 1), jnp.float32),
        grid=(num_split, spc),
        in_specs=[
            pl.BlockSpec((tile_b, C), in_map),   # last dim == full C (legal)
            pl.BlockSpec((tile_b, C), in_map),
        ],
        out_specs=pl.BlockSpec((1, 1), lambda c, i: (c, 0),
                               memory_space=pltpu.MemorySpace.SMEM),
        scratch_shapes=[pltpu.VMEM((1, C), jnp.float32)],
        compiler_params=pltpu.CompilerParams(
            dimension_semantics=("parallel", "arbitrary"),
            vmem_limit_bytes=vmem_limit,
        ),
        cost_estimate=pl.CostEstimate(
            flops=8 * B * C, transcendentals=0, bytes_accessed=bytes_accessed),
    )(logits, labels)

    return jnp.sum(partials[:, 0]) * jnp.float32(1.0 / B)


def at_loss_ref(logits, labels):
    """Pure-JAX reference mirroring the PyTorch get_margin_loss."""
    logits = logits.astype(jnp.float32)
    labels = labels.astype(jnp.float32)
    labels = labels.at[:, 0].set(0.0)
    th_label = jnp.zeros_like(labels).at[:, 0].set(1.0)
    p_mask = labels + th_label
    n_mask = 1.0 - labels
    th = logits[:, 0:1]
    loss3 = (jax.nn.relu(1.0 - logits + th) * p_mask).sum(1)
    loss4 = (jax.nn.relu(1.0 + logits - th) * n_mask).sum(1)
    return (loss3 + loss4).mean()


if __name__ == "__main__":
    key = jax.random.PRNGKey(0)
    k1, k2, k3, k4 = jax.random.split(key, 4)

    # Small shape consistent with the module: batch=8, num_classes=16 (f32).
    B, C = 8, 16
    logits = jax.random.normal(k1, (B, C), dtype=jnp.float32)
    labels = (jax.random.uniform(k2, (B, C)) > 0.7).astype(jnp.float32)

    loss = at_loss(logits, labels)
    jax.block_until_ready(loss)
    loss_ref = at_loss_ref(logits, labels)
    assert jnp.allclose(loss, loss_ref, atol=1e-5, rtol=1e-5), (loss, loss_ref)

    # Exercise: multi-tile grid, 2-way core split, partial boundary block,
    # C not a multiple of 128, narrow (bf16) input dtypes.
    B2, C2 = 200, 97
    logits2 = jax.random.normal(k3, (B2, C2), dtype=jnp.float32).astype(jnp.bfloat16)
    labels2 = (jax.random.uniform(k4, (B2, C2)) > 0.9).astype(jnp.bfloat16)

    loss2 = at_loss(logits2, labels2, tile_b=64)
    jax.block_until_ready(loss2)
    loss2_ref = at_loss_ref(logits2, labels2)
    assert jnp.allclose(loss2, loss2_ref, atol=1e-2, rtol=1e-4), (loss2, loss2_ref)

    # TODO(synk): unused helpers of the module (get_entropy_loss, get_margin_loss2,
    # get_label) are not part of forward() and are not implemented as kernels.
    print("KERNEL_OK")
</pallas_src>

<mosaic_0001>
module attributes {stable_mosaic.version = 11 : i64} {
  func.func @_at_loss_kernel(%arg0: i32, %arg1: i32, %arg2: memref<8x16xf32, #tpu.memory_space<vmem>>, %arg3: memref<8x16xf32, #tpu.memory_space<vmem>>, %arg4: memref<1x1xf32, #tpu.memory_space<smem>>, %arg5: memref<1x16xf32, #tpu.memory_space<vmem>>) attributes {dimension_semantics = [#tpu.dimension_semantics<parallel>, #tpu.dimension_semantics<arbitrary>], iteration_bounds = array<i64: 1, 1>, scalar_prefetch = 0 : i64, scratch_operands = 1 : i64, tpu.core_type = #tpu.core_type<tc>, window_params = [{transform_indices = @transform_0, window_bounds = array<i64: 8, 16>}, {transform_indices = @transform_1, window_bounds = array<i64: 8, 16>}, {transform_indices = @transform_2, window_bounds = array<i64: 1, 1>}]} {
    %c0_i32 = arith.constant 0 : i32
    %0 = arith.cmpi eq, %arg1, %c0_i32 : i32
    %1 = arith.extui %0 : i1 to i32
    %c0_i32_0 = arith.constant 0 : i32
    %2 = arith.cmpi ne, %1, %c0_i32_0 : i32
    scf.if %2 {
      %cst_17 = arith.constant 0.000000e+00 : f32
      %43 = vector.broadcast %cst_17 : f32 to vector<1x16xf32>
      %c0_18 = arith.constant 0 : index
      %c0_19 = arith.constant 0 : index
      %44 = vector.load %arg5[%c0_18, %c0_19] : memref<1x16xf32, #tpu.memory_space<vmem>>, vector<1x16xf32>
      tpu.vector_store %arg5[%c0_18, %c0_19], %43 {strides = array<i32>} : memref<1x16xf32, #tpu.memory_space<vmem>>, vector<1x16xf32>,
    } else {
    }
    %c0 = arith.constant 0 : index
    %c0_1 = arith.constant 0 : index
    %3 = vector.load %arg2[%c0, %c0_1] : memref<8x16xf32, #tpu.memory_space<vmem>>, vector<8x16xf32>
    %c0_2 = arith.constant 0 : index
    %c0_3 = arith.constant 0 : index
    %4 = vector.load %arg3[%c0_2, %c0_3] : memref<8x16xf32, #tpu.memory_space<vmem>>, vector<8x16xf32>
    %5 = tpu.iota {dimensions = array<i32: 1>} : vector<8x16xi32>
    %6 = tpu.iota {dimensions = array<i32: 0>} : vector<8x16xi32>
    %c1_i32 = arith.constant 1 : i32
    %7 = arith.muli %arg0, %c1_i32 : i32
    %8 = arith.addi %7, %arg1 : i32
    %c8_i32 = arith.constant 8 : i32
    %9 = arith.muli %8, %c8_i32 : i32
    %c1_i32_4 = arith.constant 1 : i32
    %10 = vector.broadcast %c1_i32_4 : i32 to vector<8x16xi32>
    %11 = arith.cmpi sge, %5, %10 : vector<8x16xi32>
    %12 = vector.broadcast %9 : i32 to vector<8x16xi32>
    %13 = arith.addi %6, %12 : vector<8x16xi32>
    %c8_i32_5 = arith.constant 8 : i32
    %14 = vector.broadcast %c8_i32_5 : i32 to vector<8x16xi32>
    %15 = arith.cmpi slt, %13, %14 : vector<8x16xi32>
    %16 = arith.andi %11, %15 : vector<8x16xi1>
    %17 = vector.extract_strided_slice %3 {offsets = [0, 0], sizes = [8, 1], strides = [1, 1]} : vector<8x16xf32> to vector<8x1xf32>
    %cst = arith.constant 1.000000e+00 : f32
    %18 = vector.broadcast %cst : f32 to vector<8x16xf32>
    %19 = arith.subf %18, %3 : vector<8x16xf32>
    %20 = vector.broadcast %17 : vector<8x1xf32> to vector<8x16xf32>
    %21 = arith.addf %19, %20 : vector<8x16xf32>
    %cst_6 = arith.constant 0.000000e+00 : f32
    %22 = vector.broadcast %cst_6 : f32 to vector<8x16xf32>
    %23 = arith.maximumf %21, %22 : vector<8x16xf32>
    %cst_7 = arith.constant 1.000000e+00 : f32
    %24 = vector.broadcast %cst_7 : f32 to vector<8x16xf32>
    %25 = arith.addf %24, %3 : vector<8x16xf32>
    %26 = vector.broadcast %17 : vector<8x1xf32> to vector<8x16xf32>
    %27 = arith.subf %25, %26 : vector<8x16xf32>
    %cst_8 = arith.constant 0.000000e+00 : f32
    %28 = vector.broadcast %cst_8 : f32 to vector<8x16xf32>
    %29 = arith.maximumf %27, %28 : vector<8x16xf32>
    %30 = arith.subf %23, %29 : vector<8x16xf32>
    %31 = arith.mulf %4, %30 : vector<8x16xf32>
    %32 = arith.addf %29, %31 : vector<8x16xf32>
    %cst_9 = arith.constant 0.000000e+00 : f32
    %33 = vector.broadcast %cst_9 : f32 to vector<8x16xf32>
    %34 = arith.select %16, %32, %33 : vector<8x16xi1>, vector<8x16xf32>
    %c0_10 = arith.constant 0 : index
    %c0_11 = arith.constant 0 : index
    %35 = vector.load %arg5[%c0_10, %c0_11] : memref<1x16xf32, #tpu.memory_space<vmem>>, vector<1x16xf32>
    %cst_12 = arith.constant dense<0.000000e+00> : vector<16xf32>
    %36 = vector.multi_reduction <add>, %34, %cst_12 [0] : vector<8x16xf32> to vector<16xf32>
    %37 = vector.shape_cast %36 : vector<16xf32> to vector<1x16xf32>
    %38 = arith.addf %35, %37 : vector<1x16xf32>
    %c0_13 = arith.constant 0 : index
    %c0_14 = arith.constant 0 : index
    %39 = vector.load %arg5[%c0_13, %c0_14] : memref<1x16xf32, #tpu.memory_space<vmem>>, vector<1x16xf32>
    tpu.vector_store %arg5[%c0_13, %c0_14], %38 {strides = array<i32>} : memref<1x16xf32, #tpu.memory_space<vmem>>, vector<1x16xf32>,
    %c0_i32_15 = arith.constant 0 : i32
    %40 = arith.cmpi eq, %arg1, %c0_i32_15 : i32
    %41 = arith.extui %40 : i1 to i32
    %c0_i32_16 = arith.constant 0 : i32
    %42 = arith.cmpi ne, %41, %c0_i32_16 : i32
    scf.if %42 {
      %c1_i32_17 = arith.constant 1 : i32
      %43 = arith.muli %arg0, %c1_i32_17 : i32
      %c8_i32_18 = arith.constant 8 : i32
      %44 = arith.muli %43, %c8_i32_18 : i32
      %c8_i32_19 = arith.constant 8 : i32
      %45 = arith.subi %c8_i32_19, %44 : i32
      %c0_i32_20 = arith.constant 0 : i32
      %46 = arith.maxsi %45, %c0_i32_20 : i32
      %c8_i32_21 = arith.constant 8 : i32
      %47 = arith.minsi %46, %c8_i32_21 : i32
      %48 = arith.sitofp %47 : i32 to f32
      %c0_22 = arith.constant 0 : index
      %c0_23 = arith.constant 0 : index
      %49 = vector.load %arg5[%c0_22, %c0_23] : memref<1x16xf32, #tpu.memory_space<vmem>>, vector<1x16xf32>
      %50 = vector.shape_cast %49 : vector<1x16xf32> to vector<1x1x16xf32>
      %cst_24 = arith.constant dense<0.000000e+00> : vector<1xf32>
      %51 = vector.multi_reduction <add>, %50, %cst_24 [1, 2] : vector<1x1x16xf32> to vector<1xf32>
      %52 = vector.shape_cast %51 : vector<1xf32> to vector<1x1x1xf32>
      %53 = vector.extract %52[0, 0, 0] : f32 from vector<1x1x1xf32>
      %cst_25 = arith.constant 2.000000e+00 : f32
      %54 = arith.mulf %cst_25, %48 : f32
      %55 = arith.addf %53, %54 : f32
      %c0_26 = arith.constant 0 : index
      %c0_27 = arith.constant 0 : index
      %56 = memref.load %arg4[%c0_26, %c0_27] : memref<1x1xf32, #tpu.memory_space<smem>>
      memref.store %55, %arg4[%c0_26, %c0_27] : memref<1x1xf32, #tpu.memory_space<smem>>
    } else {
    }
    return
  }
  func.func @transform_0(%arg0: i32, %arg1: i32) -> (i32, i32) {
    %c1_i32 = arith.constant 1 : i32
    %0 = arith.muli %arg0, %c1_i32 : i32
    %1 = arith.addi %0, %arg1 : i32
    %c0_i32 = arith.constant 0 : i32
    %2 = arith.minsi %1, %c0_i32 : i32
    %c0_i32_0 = arith.constant 0 : i32
    %c0_i32_1 = arith.constant 0 : i32
    return %2, %c0_i32_0 : i32, i32
  }
  func.func @transform_1(%arg0: i32, %arg1: i32) -> (i32, i32) {
    %c1_i32 = arith.constant 1 : i32
    %0 = arith.muli %arg0, %c1_i32 : i32
    %1 = arith.addi %0, %arg1 : i32
    %c0_i32 = arith.constant 0 : i32
    %2 = arith.minsi %1, %c0_i32 : i32
    %c0_i32_0 = arith.constant 0 : i32
    %c0_i32_1 = arith.constant 0 : i32
    return %2, %c0_i32_0 : i32, i32
  }
  func.func @transform_2(%arg0: i32, %arg1: i32) -> (i32, i32) {
    %c0_i32 = arith.constant 0 : i32
    %c0_i32_0 = arith.constant 0 : i32
    return %arg0, %c0_i32 : i32, i32
  }
}

</mosaic_0001>

<bundles_post_ra>
// kernel: tpu_custom_call.1
= control target key start
LH: loop header
LB: loop body
LE: loop exit
PB: predicated region body
PF: predicated region fallthrough
CT: control target
= control target key end

     0   :  { %7 = vsyncpa [#allocation4], 0  ;;  %s236_s0 = inlined_call_operand.hbm [shape: f32[8,16], index: 0, kind: input, shape index: {}]   ;;  %s237_s1 = inlined_call_operand.hbm [shape: f32[8,16], index: 1, kind: input, shape index: {}]   ;;  %s238_s2 = inlined_call_operand.hbm [shape: f32[1,1], index: 2, kind: output, shape index: {}]  }
   0x1   :  { %8 = vsyncpa [#allocation7], 0 }
   0x2   :  { %9 = vsyncpa [#allocation5], 0  ;;  %s204_s9 = smov [#allocation3]   ;;  %s205_s11 = smov [#allocation6]  }
   0x3   :  { %s21_s10 = sshll.u32 %s204_s9, 4  ;;  %s36_s12 = sshll.u32 %s205_s11, 4  ;;  %s22_s10 = int_to_ptr.vmem [resolvable:$true] %s21_s10  ;;  %s37_s12 = int_to_ptr.vmem [resolvable:$true] %s36_s12 }
   0x4   :  { %s158_s13 = scalar_lea.vmem %s22_s10, 128  ;;  %p163_p1 = scmp.lt.s32.totalorder %s22_s10, %s22_s10 }
   0x5   :  { %p159_p0 = scmp.ne.s32.totalorder %s22_s10, %s158_s13  ;;  %p164_p2 = scmp.lt.s32.totalorder %s158_s13, %s158_s13 }
   0x7   :  { %p165_p3 = por %p164_p2, %p163_p1 }
   0x9   :  { %p166_p4 = pnand %p165_p3, %p159_p0 }
   0xb   :  { %169 = shalt.err (!%p166_p4)
}
   0xc   :  { %24 = dma.hbm_to_vmem [thread:$0]  %s236_s0, 128, %s22_s10, [#allocation4]  }
   0xd   :  { %s178_s16 = scalar_lea.vmem %s37_s12, 128  ;;  %p183_p6 = scmp.lt.s32.totalorder %s37_s12, %s37_s12 }
   0xe   :  { %p179_p5 = scmp.ne.s32.totalorder %s37_s12, %s178_s16  ;;  %p184_p7 = scmp.lt.s32.totalorder %s178_s16, %s178_s16 }
  0x10   :  { %p185_p8 = por %p184_p7, %p183_p6 }
  0x12   :  { %p186_p9 = pnand %p185_p8, %p179_p5 }
  0x14   :  { %189 = shalt.err (!%p186_p9)
}
  0x15   :  { %39 = dma.hbm_to_vmem [thread:$0]  %s237_s1, 128, %s37_s12, [#allocation7]  }
  0x16   :  { %198 = dma.done.wait [#allocation4], 128  }
  0x17   :  { %199 = vsyncadd [#allocation4], 4294967168 }
  0x18   :  { %200 = dma.done.wait [#allocation7], 128  }
  0x19   :  { %201 = vsyncadd [#allocation7], 4294967168  ;;  %v206_v0 = vmov 0   ;;  %v58_v1 = vld [vmem:[#allocation3] sm:$0xff]  ;;  %vm56_vm0 = vcmask 122880   ;;  %v207_v2 = vmov 0.0   ;;  %v60_v5 = vlaneseq }
  0x1a   :  { %149 = vset.pattern.permute.xlu0 %v206_v0  ;;  %57 = vst.msk [vmem:[#allocation2] sm:$0x1] %vm56_vm0, %v207_v2  ;;  %v71_v3 = vsub.f32 1.0, %v58_v1  ;;  %v79_v4 = vadd.f32 1.0, %v58_v1  ;;  %v59_v11 = vld [vmem:[#allocation6] sm:$0xff]  ;;  %vm87_vm2 = vcmask 130048  }
  0x1b   :  { %74 = vperm.xlu0 %149, %v58_v1   ;;  %v61_v12 = vand.u32 127, %v60_v5  ;;  %s208_s19 = smov [#allocation8]  }
  0x1d   :  { %vm66_vm1 = vcmp.ge.s32.totalorder %v61_v12, 1 }
  0x21   :  { %v86_v23 = vld [vmem:[#allocation2] sm:$0x1] }
  0x96   :  { %v75_v6 = vpop.permute.xlu0 %74 }
  0x97   :  { %v77_v7 = vadd.f32 %v75_v6, %v71_v3  ;;  %v80_v8 = vsub.f32 %v79_v4, %v75_v6 }
  0x99   :  { %v78_v9 = vmax.f32 %v77_v7, 0.0  ;;  %v81_v10 = vmax.f32 %v80_v8, 0.0 }
  0x9b   :  { %v82_v13 = vsub.f32 %v78_v9, %v81_v10 }
  0x9d   :  { %v83_v14 = vmul.f32 %v82_v13, %v59_v11 }
  0x9f   :  { %v84_v15 = vadd.f32 %v83_v14, %v81_v10 }
  0xa1   :  { %v85_v16 = vsel %vm66_vm1, %v84_v15, 0.0 }
  0xa2   :  { %v88_v17 = vsel %vm87_vm2, %v85_v16, 0.0 }
  0xa3   :  { %v89_v18 = vrot.slane %v88_v17, 4 }
  0xa5   :  { %v90_v19 = vadd.f32 %v89_v18, %v88_v17 }
  0xa7   :  { %v91_v20 = vrot.slane %v90_v19, 2 }
  0xa9   :  { %v92_v21 = vadd.f32 %v91_v20, %v90_v19 }
  0xab   :  { %v93_v22 = vrot.slane %v92_v21, 1 }
  0xad   :  { %v94_v24 = vadd.f32 %v93_v22, %v92_v21 }
  0xaf   :  { %v95_v25 = vadd.f32 %v94_v24, %v86_v23 }
  0xb1   :  { %97 = vst.msk [vmem:[#allocation2] sm:$0x1] %vm56_vm0, %v95_v25 }
  0xb8   :  { %v108_v26 = vld [vmem:[#allocation2] sm:$0x1] }
  0xb9   :  { %v109_v27 = vsel %vm56_vm0, %v108_v26, 0.0 }
  0xba   :  { %110 = vadd.xlane.f32.xlu0 %v109_v27 }
 0x143   :  { %v111_v28 = vpop.xlane.xlu0 %110 }
 0x144   :  { %v112_v29 = vrot.slane %v111_v28, 4 }
 0x146   :  { %v113_v30 = vadd.f32 %v112_v29, %v111_v28 }
 0x148   :  { %v114_v31 = vrot.slane %v113_v30, 2 }
 0x14a   :  { %v115_v32 = vadd.f32 %v114_v31, %v113_v30 }
 0x14c   :  { %v116_v33 = vrot.slane %v115_v32, 1 }
 0x14e   :  { %v117_v34 = vadd.f32 %v116_v33, %v115_v32 }
 0x150   :  { %142 = vpush %v117_v34 }
 0x181   :  { %s143_s0 = spop %142 }
 0x182   :  { %s120_s1 = sadd.f32 16.0, %s143_s0 }
 0x184   :  { %122 = sst [smem:[#allocation8]] %s120_s1 }
 0x185   :  { %130 = dma.smem_to_hbm %s208_s19, 16, %s238_s2, [#allocation5]  }
 0x186   :  { %202 = dma.done.wait [#allocation5], 16  }
 0x187   :  { %203 = vsyncadd [#allocation5], 4294967280 }
 0x188   :  { %134 = sfence }
 0x189   :  { %135 = vsyncpa [#allocation4], 1 }
 0x18a   :  { %136 = vsyncpa [#allocation7], 1 }
 0x18b   :  { %137 = vsyncpa [#allocation5], 1 }

</bundles_post_ra>
